<compile_context>
chip_gen: v5e
topology: v5e:2x2
jax: 0.10.0
libtpu: 0.0.40
codegen_flags: <defaults>
</compile_context>

<pallas_src>
import jax
import jax.numpy as jnp
from jax.experimental import pallas as pl
from jax.experimental.pallas import tpu as pltpu


def _concat_add_kernel(x_ref, w_ref, b_ref, o_ref):
    """One (batch, spatial-tile) step of the collapsed ConcatAddTable.

    x_ref: (Cin, T)   input tile: channels on sublanes, spatial on lanes
    w_ref: (Cout, Cin) pre-summed branch weights
    b_ref: (Cout, 1)   pre-summed branch biases
    o_ref: (Cout, T)   output tile (lane-dense: T is a multiple of 128 or full)
    """
    acc = jnp.dot(w_ref[...], x_ref[...], preferred_element_type=jnp.float32)
    o_ref[...] = (acc + b_ref[...].astype(jnp.float32)).astype(o_ref.dtype)


def _pick_spatial_tile(hw):
    """Largest multiple of 128 that divides hw (capped), else the full extent."""
    if hw % 128 == 0:
        for cand in (2048, 1024, 512, 256, 128):
            if hw % cand == 0:
                return cand
    return hw


def concat_add_table_forward(x_nchw, weights, biases, *, tile_hw=None):
    """Forward pass of ConcatAddTable([Conv2d(1x1)] * NB).

    x_nchw:  [B, Cin, H, W]
    weights: [NB, Cout, Cin]  (PyTorch conv weight [Cout, Cin, 1, 1] squeezed)
    biases:  [NB, Cout]
    returns: [B, Cout, H, W]
    """
    B, Cin, H, W = x_nchw.shape
    NB, Cout, _ = weights.shape
    HW = H * W

    # Collapse the branch sum exactly (fp32 pre-sum), then match input dtype.
    w_sum = weights.astype(jnp.float32).sum(axis=0).astype(x_nchw.dtype)  # (Cout, Cin)
    b_sum = biases.astype(jnp.float32).sum(axis=0)[:, None]               # (Cout, 1) f32

    # NCHW -> (B, Cin, H*W): a pure reshape, no transpose / extra HBM traffic.
    x3d = x_nchw.reshape(B, Cin, HW)

    if tile_hw is None:
        tile_hw = _pick_spatial_tile(HW)
    assert HW % tile_hw == 0

    grid = (B, HW // tile_hw)

    out3d = pl.pallas_call(
        _concat_add_kernel,
        out_shape=jax.ShapeDtypeStruct((B, Cout, HW), x_nchw.dtype),
        grid_spec=pltpu.PrefetchScalarGridSpec(
            num_scalar_prefetch=0,
            grid=grid,
            in_specs=[
                # (batch squeezed, Cin sublanes, spatial tile on lanes)
                pl.BlockSpec((None, Cin, tile_hw), lambda b, s: (b, 0, s)),
                # tiny invariant weight / bias blocks, same block every step
                pl.BlockSpec((Cout, Cin), lambda b, s: (0, 0)),
                pl.BlockSpec((Cout, 1), lambda b, s: (0, 0)),
            ],
            out_specs=pl.BlockSpec((None, Cout, tile_hw), lambda b, s: (b, 0, s)),
        ),
        compiler_params=pltpu.CompilerParams(
            dimension_semantics=("parallel", "parallel")
        ),
    )(x3d, w_sum, b_sum)

    return out3d.reshape(B, Cout, H, W)


def reference_forward(x_nchw, weights, biases):
    """Pure-JAX reference: branch-by-branch sum_i conv1x1_i(x) (no collapse)."""
    B, Cin, H, W = x_nchw.shape
    NB, Cout, _ = weights.shape
    x2d = jnp.transpose(x_nchw, (0, 2, 3, 1)).reshape(B * H * W, Cin)
    out = jnp.zeros((B * H * W, Cout), jnp.float32)
    for i in range(NB):
        out = out + x2d.astype(jnp.float32) @ weights[i].T.astype(jnp.float32) \
                  + biases[i][None, :].astype(jnp.float32)
    return out.reshape(B, H, W, Cout).transpose(0, 3, 1, 2).astype(x_nchw.dtype)


if __name__ == "__main__":
    key = jax.random.PRNGKey(0)
    B, Cin, H, W = 2, 4, 16, 16      # input [2, 4, 16, 16], NCHW
    Cout = 4                          # branches must produce identical shapes
    NB = 3                            # number of branches in the table

    k_x, k_w, k_b = jax.random.split(key, 3)
    x = jax.random.normal(k_x, (B, Cin, H, W), dtype=jnp.float32)
    # Synthetic per-branch Conv2d(1x1) parameters ([Cout, Cin, 1, 1] squeezed).
    weights = jax.random.normal(k_w, (NB, Cout, Cin), dtype=jnp.float32) * 0.1
    biases = jax.random.normal(k_b, (NB, Cout), dtype=jnp.float32) * 0.1

    out = concat_add_table_forward(x, weights, biases)
    out = jax.block_until_ready(out)

    ref = reference_forward(x, weights, biases)
    assert out.shape == (B, Cout, H, W)
    assert jnp.allclose(out, ref, atol=1e-5, rtol=1e-5)

    # TODO(synk): ConcatAddTable is a generic container; branches other than
    # 1x1 convs (e.g. arbitrary submodules) would need their own fused kernels.

    print("KERNEL_OK")
</pallas_src>

<mosaic_0001>
module attributes {stable_mosaic.version = 11 : i64} {
  func.func @_concat_add_kernel(%arg0: i32, %arg1: i32, %arg2: memref<1x4x256xf32, #tpu.memory_space<vmem>>, %arg3: memref<4x4xf32, #tpu.memory_space<vmem>>, %arg4: memref<4x1xf32, #tpu.memory_space<vmem>>, %arg5: memref<1x4x256xf32, #tpu.memory_space<vmem>>) attributes {dimension_semantics = [#tpu.dimension_semantics<parallel>, #tpu.dimension_semantics<parallel>], iteration_bounds = array<i64: 2, 1>, scalar_prefetch = 0 : i64, scratch_operands = 0 : i64, tpu.core_type = #tpu.core_type<tc>, window_params = [{transform_indices = @transform_0, window_bounds = array<i64: 1, 4, 256>}, {pipeline_mode = #tpu.pipeline_mode<synchronous>, transform_indices = @transform_1, window_bounds = array<i64: 4, 4>}, {pipeline_mode = #tpu.pipeline_mode<synchronous>, transform_indices = @transform_2, window_bounds = array<i64: 4, 1>}, {transform_indices = @transform_3, window_bounds = array<i64: 1, 4, 256>}]} {
    %c0 = arith.constant 0 : index
    %c0_0 = arith.constant 0 : index
    %0 = vector.load %arg3[%c0, %c0_0] : memref<4x4xf32, #tpu.memory_space<vmem>>, vector<4x4xf32>
    %c0_1 = arith.constant 0 : index
    %c0_2 = arith.constant 0 : index
    %c0_3 = arith.constant 0 : index
    %1 = vector.load %arg2[%c0_1, %c0_2, %c0_3] : memref<1x4x256xf32, #tpu.memory_space<vmem>>, vector<1x4x256xf32>
    %2 = vector.shape_cast %1 : vector<1x4x256xf32> to vector<4x256xf32>
    %cst = arith.constant dense<0.000000e+00> : vector<4x256xf32>
    %3 = tpu.matmul %0, %2, %cst {dimension_numbers = #tpu.dot_dimension_numbers<[1], [0], [0], [1], [0, 0, 1, 1], [], []>} : vector<4x4xf32>, vector<4x256xf32>, vector<4x256xf32> -> vector<4x256xf32>
    %c0_4 = arith.constant 0 : index
    %c0_5 = arith.constant 0 : index
    %4 = vector.load %arg4[%c0_4, %c0_5] : memref<4x1xf32, #tpu.memory_space<vmem>>, vector<4x1xf32>
    %5 = vector.broadcast %4 : vector<4x1xf32> to vector<4x256xf32>
    %6 = arith.addf %3, %5 : vector<4x256xf32>
    %c0_6 = arith.constant 0 : index
    %c0_7 = arith.constant 0 : index
    %c0_8 = arith.constant 0 : index
    %7 = vector.load %arg5[%c0_6, %c0_7, %c0_8] : memref<1x4x256xf32, #tpu.memory_space<vmem>>, vector<1x4x256xf32>
    %8 = vector.shape_cast %7 : vector<1x4x256xf32> to vector<4x256xf32>
    %9 = vector.shape_cast %6 : vector<4x256xf32> to vector<1x4x256xf32>
    tpu.vector_store %arg5[%c0_6, %c0_7, %c0_8], %9 {strides = array<i32>} : memref<1x4x256xf32, #tpu.memory_space<vmem>>, vector<1x4x256xf32>,
    return
  }
  func.func @transform_0(%arg0: i32, %arg1: i32) -> (i32, i32, i32) {
    %c0_i32 = arith.constant 0 : i32
    %c0_i32_0 = arith.constant 0 : i32
    return %arg0, %c0_i32, %arg1 : i32, i32, i32
  }
  func.func @transform_1(%arg0: i32, %arg1: i32) -> (i32, i32) {
    %c0_i32 = arith.constant 0 : i32
    %c0_i32_0 = arith.constant 0 : i32
    %c0_i32_1 = arith.constant 0 : i32
    return %c0_i32, %c0_i32_0 : i32, i32
  }
  func.func @transform_2(%arg0: i32, %arg1: i32) -> (i32, i32) {
    %c0_i32 = arith.constant 0 : i32
    %c0_i32_0 = arith.constant 0 : i32
    %c0_i32_1 = arith.constant 0 : i32
    return %c0_i32, %c0_i32_0 : i32, i32
  }
  func.func @transform_3(%arg0: i32, %arg1: i32) -> (i32, i32, i32) {
    %c0_i32 = arith.constant 0 : i32
    %c0_i32_0 = arith.constant 0 : i32
    return %arg0, %c0_i32, %arg1 : i32, i32, i32
  }
}

</mosaic_0001>

<bundles_post_ra>
// kernel: tpu_custom_call.1
= control target key start
LH: loop header
LB: loop body
LE: loop exit
PB: predicated region body
PF: predicated region fallthrough
CT: control target
= control target key end

     0   :  { %8 = vsyncpa [#allocation3], 0  ;;  %s728_s0 = inlined_call_operand.hbm [shape: f32[2,4,256], index: 0, kind: input, shape index: {}]   ;;  %s729_s1 = inlined_call_operand.vmem [shape: f32[4,4], index: 1, kind: input, shape index: {}]   ;;  %s730_s2 = inlined_call_operand.vmem [shape: f32[4,1], index: 2, kind: input, shape index: {}]   ;;  %s731_s3 = inlined_call_operand.hbm [shape: f32[2,4,256], index: 3, kind: output, shape index: {}]  }
   0x1   :  { %10 = vsyncpa [#allocation3 + $0x1], 0 }
   0x2   :  { %11 = vsyncpa [#allocation4], 0 }
   0x3   :  { %13 = vsyncpa [#allocation4 + $0x1], 0  ;;  %s599_s12 = smov 0   ;;  %s601_s13 = smov 0  }
   0x4   :  { %s603_s14 = smov 0   ;;  %s605_s15 = smov 0  }
   0x5   :  { %s607_s16 = smov 0   ;;  %s609_s17 = smov 0  }
   0x6 LB: > { %s379_s18 = sadd.s32 4294967295, %s576_s17   ;;  %s380_s19 = sadd.s32 4294967294, %s576_s17   ;;  %s576_s17 = sphi %s609_s17, %s19_s17   ;;  %s572_s16 = sphi %s607_s16, %s740_s16   ;;  %s568_s15 = sphi %s605_s15, %s739_s15   ;;  %s564_s14 = sphi %s603_s14, %s738_s14   ;;  %s560_s13 = sphi %s601_s13, %s737_s13   ;;  %s556_s12 = sphi %s599_s12, %s736_s12  }
   0x7   : > { %s31_s20 = sadd.s32 1, %s572_s16  ;;  %s40_s21 = sadd.s32 1, %s564_s14 }
   0x8   : > { %p33_p0 = scmp.ge.s32.totalorder %s31_s20, 2  ;;  %p47_p1 = scmp.ne.s32.totalorder %s564_s14, %s560_s13 }
   0x9   : > { %p48_p2 = scmp.eq.s32.totalorder %s576_s17, 0  ;;  %p53_p3 = scmp.ne.s32.totalorder %s560_s13, %s556_s12 }
   0xa   : > { %s742_s20 = smov (%p33_p0, %s31_s20), 0  ;;  %p54_p5 = scmp.eq.s32.totalorder %s379_s18, 0 }
   0xb   : > { %p640_p4 = por %p48_p2, %p47_p1  ;;  %s35_s23 = ssub.s32 %s572_s16, %s742_s20 }
   0xc   : > { %p121_p6 = scmp.eq.s32.totalorder %s379_s18, 1  ;;  %p38_p7 = scmp.eq.s32.totalorder %s35_s23, 0 }
   0xd   : > { %p646_p8 = por %p54_p5, %p53_p3  ;;  %p127_p10 = scmp.eq.s32.totalorder %s380_s19, 1 }
   0xe   : > { %p650_p9 = por %p121_p6, %p47_p1  ;;  %p382_p12 = scmp.ge.s32.totalorder %s576_s17, 2 }
   0xf   : > { %s655_s26 = scalar_select %p38_p7, %s564_s14, %s40_s21  }
  0x10   : > { %p657_p11 = por %p127_p10, %p53_p3  ;;  %p412_p13 = scmp.lt.s32.totalorder %s576_s17, 2 }
  0x11   : > { %s153_s28 = sand.u32 1, %s564_s14   ;;  %s398_s30 = sshll.u32 %s572_s16, 3 }
  0x12   : > { %s383_s29 = sshll.u32 %s153_s28, 3  ;;  %s164_s6 = scalar_lea.hbm %s728_s0, %s398_s30 }
  0x13   : > { %s157_s7 = scalar_lea.vmem [#allocation2], %s383_s29  ;;  %s166_s9 = sshll.u32 %s164_s6, 4  ;;  %s167_s9 = int_to_ptr.hbm [resolvable:$true] %s166_s9 }
  0x14   : > { %s168_s8 = sshll.u32 %s157_s7, 4  ;;  %p405_p0 = pnand %p412_p13, %p640_p4  ;;  %s169_s8 = int_to_ptr.vmem [resolvable:$true] %s168_s8 }
  0x15   : > { %p386_p1 = scmp.ge.s32.totalorder %s576_s17, 1  ;;  %p173_p2 = scmp.lt.s32.totalorder %s576_s17, 3 }
  0x16   : > { %s154_s10 = scalar_lea.sflag [#allocation3], %s153_s28 }
  0x17   : > { %407 = dma.hbm_to_vmem [thread:$0]  (!%p405_p0), %s167_s9, 128, %s169_s8, %s154_s10  }
  0x18   : > { %p174_p3 = pnand %p386_p1, %p173_p2 }
  0x19   : > { %s673_s11 = sand.u32 (!%p174_p3), 1, %s560_s13  }
  0x1a   : > { %177 = sbr.rel (%p174_p3) target bundleno = 176 (0xb0), region = 32  ;;  %s387_s18 = sshll.u32 (!%p174_p3), %s673_s11, 3 }
  0x1b   : > { %s180_s19 = scalar_lea.sflag (!%p174_p3), [#allocation3], %s673_s11  ;;  %s183_s21 = scalar_lea.vmem (!%p174_p3), [#allocation2], %s387_s18 }
  0x1f   : > { %547 = dma.done.wait (%p646_p8), %s180_s19, 128  }
  0x20   : > { %549 = vsyncadd (%p646_p8), %s180_s19, 4294967168  ;;  %v578_v0 = vmov 0   ;;  %v210_v1 = vld [vmem:[%s183_s21] sm:$0xff]  ;;  %v211_v2 = vld [vmem:[%s730_s2] sm:$0xf]  ;;  %vm225_vm0 = vcmask 1043456  }
  0x21   : > { %463 = vset.pattern.permute.xlu0 %v578_v0  ;;  %218 = vst [vmem:[#allocation1] ss:$2 sm:$0xff] %v210_v1  ;;  %v209_v3 = vld [vmem:[%s729_s1] sm:$0xf]  ;;  %vm221_vm1 = vcmask 31744   ;;  %s399_s24 = sshll.u32 %s568_s15, 3 }
  0x22   : > { %214 = vperm.xlu0 %463, %v211_v2   ;;  %s290_s5 = scalar_lea.hbm %s731_s3, %s399_s24  ;;  %s206_s6 = scalar_lea.vmem [#allocation5], %s387_s18 }
  0x23   : > { %s292_s7 = sshll.u32 %s206_s6, 4  ;;  %s294_s8 = sshll.u32 %s290_s5, 4  ;;  %s293_s7 = int_to_ptr.vmem [resolvable:$true] %s292_s7  ;;  %s295_s8 = int_to_ptr.hbm [resolvable:$true] %s294_s8 }
  0x24   : > { %s277_s15 = scalar_lea.sflag [#allocation4], %s673_s11  ;;  %s508_s9 = sshra.s32 %s295_s8, 4  ;;  %s509_s9 = int_to_ptr.hbm [resolvable:$true] %s508_s9 }
  0x25   : > { %s510_s10 = scalar_lea.hbm %s509_s9, 8  ;;  %s514_s18 = scalar_lea.hbm %s731_s3, 16 }
  0x26   : > { %p511_p4 = scmp.ne.s32.totalorder %s509_s9, %s510_s10  ;;  %p515_p7 = scmp.lt.s32.totalorder %s509_s9, %s731_s3 }
  0x27   : > { %p516_p8 = scmp.lt.s32.totalorder %s514_s18, %s510_s10 }
  0x28   : > { %v219_v4 = vld.sshfl [vmem:[#allocation1] sm:$0xff pattern:$0x75316420]  ;;  %v220_v5 = vld.sshfl [vmem:[#allocation1 + $0x8] sm:$0xff pattern:$0x75316420]  ;;  %p512_p5 = pnand %p511_p4, %p650_p9 }
  0x29   : > { %389 = vmatpush.msk.msra.mxu0 %vm225_vm0, %v219_v4  ;;  %391 = vmatpush.msk.msra.mxu1 %vm225_vm0, %v220_v5  ;;  %p517_p10 = por %p516_p8, %p515_p7 }
  0x2a   : > { %390 = vmatmul.msk.f32.vlgmr.msra.gmra.mxu0 %vm221_vm1, %v209_v3  ;;  %392 = vmatmul.msk.f32.vlgmr.msra.gmra.mxu1 %vm221_vm1, %v209_v3  ;;  %p513_p6 = pneg %p512_p5 }
  0x2c   : > { %p518_p13 = pnand %p517_p10, %p513_p6 }
  0x94   : > { %v215_v6 = vpop.permute.xlu0 %214 }
  0xa7   : > { %v247_v7 = vpop.f32.mrf.mxu0  ;;  %v267_v8 = vpop.f32.mrf.mxu1 }
  0xa8   : > { %v268_v9 = vadd.f32 %v267_v8, %v215_v6  ;;  %v248_v10 = vadd.f32 %v247_v7, %v215_v6 }
  0xaa   : > { %v272_v11 = vrot.slane %v268_v9, 4 }
  0xac   : > { %v273_v12 = vsel %vm225_vm0, %v248_v10, %v272_v11 }
  0xad   : > { %275 = vst [vmem:[%s206_s6] sm:$0xff] %v273_v12 }
  0xae   : > { %521 = shalt.err (!%p518_p13)
}
  0xaf   : > { %402 = dma.vmem_to_hbm [thread:$0]  (%p650_p9), %s293_s7, 128, %s295_s8, %s277_s15  }
  0xb0 PF: > { %s306_s11 = sand.u32 1, %s556_s12   ;;  %p409_p0 = pnand %p382_p12, %p657_p11 }
  0xb1   : > { %s307_s28 = scalar_lea.sflag [#allocation4], %s306_s11 }
  0xb2   : > { %p410_p1 = pneg %p409_p0 }
  0xb4   : > { %551 = dma.done.wait (%p410_p1), %s307_s28, 128  }
  0xb5   : > { %553 = vsyncadd (%p410_p1), %s307_s28, 4294967168  ;;  %s19_s17 = sadd.s32 1, %s576_s17   ;;  %s736_s12 = smov %s560_s13 }
  0xb6   : > { %p16_p2 = scmp.ge.s32.totalorder %s19_s17, 4   ;;  %s737_s13 = smov %s564_s14 }
  0xb7   : > { %s738_s14 = smov %s655_s26  ;;  %s739_s15 = smov %s572_s16 }
  0xb8   : > { %s740_s16 = smov %s742_s20  ;;  %18 = sbr.rel (!%p16_p2) target bundleno = 6 (0x6), region = 77 }
  0xbd   :  { %313 = vsyncpa [#allocation3], 1 }
  0xbe   :  { %315 = vsyncpa [#allocation3 + $0x1], 1 }
  0xbf   :  { %316 = vsyncpa [#allocation4], 1 }
  0xc0   :  { %318 = vsyncpa [#allocation4 + $0x1], 1 }

</bundles_post_ra>
